<compile_context>
chip_gen: v7x
topology: tpu7x:2x2x1
jax: 0.10.0
libtpu: 0.0.40
codegen_flags: <defaults>
</compile_context>

<pallas_src>
import jax
import jax.numpy as jnp
from jax.experimental import pallas as pl
from jax.experimental.pallas import tpu as pltpu

_LANES = 128
_MIB = 1024 * 1024


def _cdiv(a, b):
    return -(-a // b)


def _sublane_tile(dtype):
    # Native second-to-last tile: 8 for 32-bit, 16 for bf16, 32 for int8/fp8.
    return max(8, 8 * (4 // jnp.dtype(dtype).itemsize))


def _vmem_caps(vmem_budget_bytes):
    try:
        cap = int(pltpu.get_tpu_info().vmem_capacity_bytes)
        if cap <= 0:
            raise ValueError("bad vmem capacity")
    except Exception:
        cap = 64 * _MIB  # conservative (v7x-sized) fallback
    budget = (cap * 3) // 4 if vmem_budget_bytes is None else int(vmem_budget_bytes)
    limit_cap = (cap * 7) // 8  # never the full physical VMEM (compiler scratch headroom)
    return budget, limit_cap


# ---------------------------------------------------------------------------
# Path A: whole (C*H*W) plane fits in VMEM -> one block per sample.
# Same kernel body handles both layouts:
#   * (1, R, 128) x with (R, 128) gamma/beta slabs
#   * (1, C, HWr, 128) x with tiny (C, 1, 128) gamma/beta (in-kernel channel broadcast)
# ---------------------------------------------------------------------------
def _make_fused_ln_kernel(eps, n_true, n_pad):
    inv_n = 1.0 / float(n_true)
    inv_nm1 = 1.0 / float(max(n_true - 1, 1))
    n_pad = float(n_pad)
    eps = float(eps)

    def kernel(x_ref, g_ref, b_ref, o_ref):
        x = x_ref[0].astype(jnp.float32)
        mean = jnp.sum(x) * inv_n
        d = x - mean
        # Two-pass variance (robust to cancellation). Zero-padded entries contribute
        # exactly n_pad * mean^2 to sum(d*d) -> subtract it; clamp tiny negatives.
        var = jnp.maximum((jnp.sum(d * d) - n_pad * mean * mean) * inv_nm1, 0.0)
        inv_std = 1.0 / (jnp.sqrt(var) + eps)        # module: (x - mean) / (std + eps)
        scale = g_ref[...] * inv_std                 # fused per-channel affine
        o_ref[0] = (d * scale + b_ref[...]).astype(o_ref.dtype)

    return kernel


# ---------------------------------------------------------------------------
# Path B: plane too big for the VMEM budget -> two-pass chunked pipeline.
# ---------------------------------------------------------------------------
def _make_stats_kernel(eps, n_true):
    inv_n = 1.0 / float(n_true)
    inv_nm1 = 1.0 / float(max(n_true - 1, 1))
    eps = float(eps)

    def kernel(x_ref, mean_ref, inv_ref, sum_ref, sq_ref):
        k = pl.program_id(1)

        @pl.when(k == 0)
        def _init():
            sum_ref[...] = jnp.zeros_like(sum_ref)
            sq_ref[...] = jnp.zeros_like(sq_ref)

        x = x_ref[0].astype(jnp.float32)                     # (rc, 128)
        sum_ref[...] = sum_ref[...] + jnp.sum(x, axis=0, keepdims=True)
        sq_ref[...] = sq_ref[...] + jnp.sum(x * x, axis=0, keepdims=True)

        @pl.when(k == pl.num_programs(1) - 1)
        def _finalize():
            s = jnp.sum(sum_ref[...])
            ss = jnp.sum(sq_ref[...])
            mean = s * inv_n
            var = jnp.maximum((ss - s * s * inv_n) * inv_nm1, 0.0)  # clamp cancellation
            r = 1.0 / (jnp.sqrt(var) + eps)
            mean_ref[...] = jnp.broadcast_to(mean, mean_ref.shape)
            inv_ref[...] = jnp.broadcast_to(r, inv_ref.shape)

    return kernel


def _normalize_kernel(x_ref, g_ref, b_ref, mean_ref, inv_ref, o_ref):
    x = x_ref[0].astype(jnp.float32)        # (rc, 128)
    m = mean_ref[0]                         # (1, 128) splat of per-sample mean
    scale = g_ref[...] * inv_ref[0]         # (rc, 128) * (1, 128)
    o_ref[0] = ((x - m) * scale + b_ref[...]).astype(o_ref.dtype)


# ---------------------------------------------------------------------------
# Wrapper
# ---------------------------------------------------------------------------
def layer_norm(x, gamma, beta, eps=1e-5, *,
               vmem_budget_bytes=None,
               chunk_rows=2048,
               force_chunked=False):
    """x: (N, C, H, W); gamma, beta: (C,). Matches the PyTorch LayerNorm forward."""
    N, C, H, W = x.shape
    hw = H * W
    chw = C * hw
    itemsize = jnp.dtype(x.dtype).itemsize
    tile = _sublane_tile(x.dtype)
    budget, limit_cap = _vmem_caps(vmem_budget_bytes)

    plane_x = chw * itemsize
    plane_f = chw * 4
    rows = _cdiv(chw, _LANES)

    # ---- Path A1: lane-aligned channel blocks, tiny (C,1,128) gamma/beta ----
    hw_rows = hw // _LANES
    use_channel_blocks = (hw % _LANES == 0) and (hw_rows % tile == 0)
    if use_channel_blocks:
        param_bytes = 2 * C * 8 * _LANES * 4               # (C,1,128) padded to 8 sublanes
        footprint_a = 4 * plane_x + 3 * plane_f + param_bytes + 2 * _MIB
    else:
        footprint_a = 4 * plane_x + 2 * plane_f + 3 * plane_f + 2 * _MIB

    use_chunked = force_chunked or footprint_a > budget

    if not use_chunked and use_channel_blocks:
        x_r = x.reshape(N, C, hw_rows, _LANES)             # free reshape, no padding
        g_s = jnp.broadcast_to(gamma.astype(jnp.float32)[:, None, None], (C, 1, _LANES))
        b_s = jnp.broadcast_to(beta.astype(jnp.float32)[:, None, None], (C, 1, _LANES))
        vmem_limit = int(min(limit_cap, max(32 * _MIB, footprint_a + 4 * _MIB)))
        # TODO(synk): split the plane across a leading size-2 parallel axis (partial-stat
        # combine) so both v7x TensorCores stay busy when N == 1.
        out = pl.pallas_call(
            _make_fused_ln_kernel(eps, chw, 0),
            out_shape=jax.ShapeDtypeStruct((N, C, hw_rows, _LANES), x.dtype),
            grid_spec=pltpu.PrefetchScalarGridSpec(
                num_scalar_prefetch=0,
                grid=(N,),
                in_specs=[
                    pl.BlockSpec((1, C, hw_rows, _LANES), lambda i: (i, 0, 0, 0)),
                    pl.BlockSpec((C, 1, _LANES), lambda i: (0, 0, 0),
                                 pipeline_mode=pl.Buffered(1)),
                    pl.BlockSpec((C, 1, _LANES), lambda i: (0, 0, 0),
                                 pipeline_mode=pl.Buffered(1)),
                ],
                out_specs=pl.BlockSpec((1, C, hw_rows, _LANES), lambda i: (i, 0, 0, 0)),
            ),
            compiler_params=pltpu.CompilerParams(
                dimension_semantics=("parallel",),
                vmem_limit_bytes=vmem_limit,
            ),
        )(x_r, g_s, b_s)
        return out.reshape(N, C, H, W)

    # ---- Slab layout (Path A2 and Path B): (N, rows_pad, 128) + f32 gamma/beta slabs ----
    if use_chunked:
        per_row = _LANES * (4 * itemsize + 7 * 4)          # pass-2 VMEM bytes per chunk row
        rc_cap = max(tile, ((budget // 2) // per_row) // tile * tile)
        rc = max(tile, min(int(chunk_rows), rows, rc_cap))
        rc -= rc % tile                                    # dtype-native sublane alignment
        n_chunks = _cdiv(rows, rc)
        rows_pad = n_chunks * rc
    else:
        rc = rows_pad = rows
        n_chunks = 1

    padded = rows_pad * _LANES
    x_flat = x.reshape(N, chw)
    g_flat = jnp.broadcast_to(gamma.astype(jnp.float32)[:, None], (C, hw)).reshape(chw)
    b_flat = jnp.broadcast_to(beta.astype(jnp.float32)[:, None], (C, hw)).reshape(chw)
    if padded != chw:
        # TODO(synk): handle the ragged (chw % 128 != 0) tail in-kernel with a lane mask
        # instead of these pad/slice copies.
        pad = padded - chw
        x_flat = jnp.pad(x_flat, ((0, 0), (0, pad)))
        g_flat = jnp.pad(g_flat, (0, pad))
        b_flat = jnp.pad(b_flat, (0, pad))
    x_r = x_flat.reshape(N, rows_pad, _LANES)
    g_slab = g_flat.reshape(rows_pad, _LANES)
    b_slab = b_flat.reshape(rows_pad, _LANES)

    if not use_chunked:
        vmem_limit = int(min(limit_cap, max(32 * _MIB, footprint_a + 4 * _MIB)))
        out = pl.pallas_call(
            _make_fused_ln_kernel(eps, chw, padded - chw),
            out_shape=jax.ShapeDtypeStruct((N, rows_pad, _LANES), x.dtype),
            grid_spec=pltpu.PrefetchScalarGridSpec(
                num_scalar_prefetch=0,
                grid=(N,),
                in_specs=[
                    pl.BlockSpec((1, rows_pad, _LANES), lambda i: (i, 0, 0)),
                    pl.BlockSpec((rows_pad, _LANES), lambda i: (0, 0),
                                 pipeline_mode=pl.Buffered(1)),
                    pl.BlockSpec((rows_pad, _LANES), lambda i: (0, 0),
                                 pipeline_mode=pl.Buffered(1)),
                ],
                out_specs=pl.BlockSpec((1, rows_pad, _LANES), lambda i: (i, 0, 0)),
            ),
            compiler_params=pltpu.CompilerParams(
                dimension_semantics=("parallel",),
                vmem_limit_bytes=vmem_limit,
            ),
        )(x_r, g_slab, b_slab)
    else:
        chunk_x = rc * _LANES * itemsize
        chunk_f = rc * _LANES * 4
        vmem_limit = int(min(limit_cap,
                             max(32 * _MIB, 4 * chunk_x + 7 * chunk_f + 4 * _MIB)))

        # Pass 1: per-sample sum / sum-of-squares accumulated over the chunk axis.
        mean_s, inv_s = pl.pallas_call(
            _make_stats_kernel(eps, chw),
            out_shape=(
                jax.ShapeDtypeStruct((N, 1, _LANES), jnp.float32),
                jax.ShapeDtypeStruct((N, 1, _LANES), jnp.float32),
            ),
            grid_spec=pltpu.PrefetchScalarGridSpec(
                num_scalar_prefetch=0,
                grid=(N, n_chunks),
                in_specs=[pl.BlockSpec((1, rc, _LANES), lambda n, k: (n, k, 0))],
                out_specs=[
                    pl.BlockSpec((1, 1, _LANES), lambda n, k: (n, 0, 0)),
                    pl.BlockSpec((1, 1, _LANES), lambda n, k: (n, 0, 0)),
                ],
                scratch_shapes=[
                    pltpu.VMEM((1, _LANES), jnp.float32),
                    pltpu.VMEM((1, _LANES), jnp.float32),
                ],
            ),
            compiler_params=pltpu.CompilerParams(
                dimension_semantics=("parallel", "arbitrary"),
                vmem_limit_bytes=vmem_limit,
            ),
        )(x_r)

        # Pass 2: chunk axis OUTER, sample axis INNER -> each gamma/beta chunk is DMA'd
        # once per chunk (constant block index across the inner sample loop) instead of
        # once per (sample, chunk). Fully parallel normalize + fused affine.
        out = pl.pallas_call(
            _normalize_kernel,
            out_shape=jax.ShapeDtypeStruct((N, rows_pad, _LANES), x.dtype),
            grid_spec=pltpu.PrefetchScalarGridSpec(
                num_scalar_prefetch=0,
                grid=(n_chunks, N),
                in_specs=[
                    pl.BlockSpec((1, rc, _LANES), lambda k, n: (n, k, 0)),
                    pl.BlockSpec((rc, _LANES), lambda k, n: (k, 0)),
                    pl.BlockSpec((rc, _LANES), lambda k, n: (k, 0)),
                    pl.BlockSpec((1, 1, _LANES), lambda k, n: (n, 0, 0)),
                    pl.BlockSpec((1, 1, _LANES), lambda k, n: (n, 0, 0)),
                ],
                out_specs=pl.BlockSpec((1, rc, _LANES), lambda k, n: (n, k, 0)),
            ),
            compiler_params=pltpu.CompilerParams(
                dimension_semantics=("parallel", "parallel"),
                vmem_limit_bytes=vmem_limit,
            ),
        )(x_r, g_slab, b_slab, mean_s, inv_s)

    out = out.reshape(N, padded)
    if padded != chw:
        out = out[:, :chw]
    return out.reshape(N, C, H, W)


def _reference(x, gamma, beta, eps):
    n, c = x.shape[0], x.shape[1]
    xf = x.reshape(n, -1).astype(jnp.float32)
    mean = xf.mean(axis=1)
    var = jnp.sum((xf - mean[:, None]) ** 2, axis=1) / (xf.shape[1] - 1)
    std = jnp.sqrt(var)
    y = (x - mean.reshape(n, 1, 1, 1)) / (std.reshape(n, 1, 1, 1) + eps)
    return gamma.reshape(1, c, 1, 1) * y + beta.reshape(1, c, 1, 1)


if __name__ == "__main__":
    key = jax.random.PRNGKey(0)
    kx, kg, kx2 = jax.random.split(key, 3)

    N, C, H, W = 2, 4, 16, 16
    x = jax.random.normal(kx, (N, C, H, W), dtype=jnp.float32)
    gamma = jax.random.uniform(kg, (C,), dtype=jnp.float32)   # module init: uniform_()
    beta = jnp.zeros((C,), dtype=jnp.float32)
    eps = 1e-5

    # Path A2 (slab layout: H*W lane-aligned but hw_rows not a sublane-tile multiple).
    y = jax.block_until_ready(layer_norm(x, gamma, beta, eps=eps))
    ref = _reference(x, gamma, beta, eps)
    assert jnp.allclose(y, ref, atol=1e-3, rtol=1e-3), "slab single-pass path mismatch"

    # Path A1 (channel-block layout with tiny in-VMEM gamma/beta), H*W = 1024.
    x2 = jax.random.normal(kx2, (2, 4, 32, 32), dtype=jnp.float32)
    y2 = jax.block_until_ready(layer_norm(x2, gamma, beta, eps=eps))
    ref2 = _reference(x2, gamma, beta, eps)
    assert jnp.allclose(y2, ref2, atol=1e-3, rtol=1e-3), "channel-block path mismatch"

    # Path B (chunked two-pass pipeline) exercised explicitly with tiny forced chunks.
    y3 = jax.block_until_ready(
        layer_norm(x2, gamma, beta, eps=eps, force_chunked=True, chunk_rows=8))
    assert jnp.allclose(y3, ref2, atol=1e-3, rtol=1e-3), "chunked path mismatch"

    print("KERNEL_OK")
</pallas_src>

<mosaic_0001>
module attributes {stable_mosaic.version = 11 : i64} {
  func.func @kernel(%arg0: i32, %arg1: memref<1x8x128xf32, #tpu.memory_space<vmem>>, %arg2: memref<8x128xf32, #tpu.memory_space<vmem>>, %arg3: memref<8x128xf32, #tpu.memory_space<vmem>>, %arg4: memref<1x8x128xf32, #tpu.memory_space<vmem>>) attributes {dimension_semantics = [#tpu.dimension_semantics<parallel>], iteration_bounds = array<i64: 2>, scalar_prefetch = 0 : i64, scratch_operands = 0 : i64, tpu.core_type = #tpu.core_type<tc>, window_params = [{transform_indices = @transform_0, window_bounds = array<i64: 1, 8, 128>}, {pipeline_mode = #tpu.pipeline_mode<synchronous>, transform_indices = @transform_1, window_bounds = array<i64: 8, 128>}, {pipeline_mode = #tpu.pipeline_mode<synchronous>, transform_indices = @transform_2, window_bounds = array<i64: 8, 128>}, {transform_indices = @transform_3, window_bounds = array<i64: 1, 8, 128>}]} {
    %c0 = arith.constant 0 : index
    %c0_0 = arith.constant 0 : index
    %c0_1 = arith.constant 0 : index
    %0 = vector.load %arg1[%c0, %c0_0, %c0_1] : memref<1x8x128xf32, #tpu.memory_space<vmem>>, vector<1x8x128xf32>
    %1 = vector.shape_cast %0 : vector<1x8x128xf32> to vector<8x128xf32>
    %2 = vector.shape_cast %1 : vector<8x128xf32> to vector<1x8x128xf32>
    %cst = arith.constant dense<0.000000e+00> : vector<1xf32>
    %3 = vector.multi_reduction <add>, %2, %cst [1, 2] : vector<1x8x128xf32> to vector<1xf32>
    %4 = vector.shape_cast %3 : vector<1xf32> to vector<1x1x1xf32>
    %5 = vector.extract %4[0, 0, 0] : f32 from vector<1x1x1xf32>
    %cst_2 = arith.constant 9.765625E-4 : f32
    %6 = arith.mulf %5, %cst_2 : f32
    %7 = vector.broadcast %6 : f32 to vector<8x128xf32>
    %8 = arith.subf %1, %7 : vector<8x128xf32>
    %9 = arith.mulf %8, %8 : vector<8x128xf32>
    %10 = vector.shape_cast %9 : vector<8x128xf32> to vector<1x8x128xf32>
    %cst_3 = arith.constant dense<0.000000e+00> : vector<1xf32>
    %11 = vector.multi_reduction <add>, %10, %cst_3 [1, 2] : vector<1x8x128xf32> to vector<1xf32>
    %12 = vector.shape_cast %11 : vector<1xf32> to vector<1x1x1xf32>
    %13 = vector.extract %12[0, 0, 0] : f32 from vector<1x1x1xf32>
    %cst_4 = arith.constant 0.000000e+00 : f32
    %14 = arith.mulf %cst_4, %6 : f32
    %15 = arith.mulf %14, %6 : f32
    %16 = arith.subf %13, %15 : f32
    %cst_5 = arith.constant 9.77517105E-4 : f32
    %17 = arith.mulf %16, %cst_5 : f32
    %cst_6 = arith.constant 0.000000e+00 : f32
    %18 = arith.maximumf %17, %cst_6 : f32
    %19 = math.sqrt %18 : f32
    %cst_7 = arith.constant 9.99999974E-6 : f32
    %20 = arith.addf %19, %cst_7 : f32
    %cst_8 = arith.constant 1.000000e+00 : f32
    %21 = arith.divf %cst_8, %20 : f32
    %c0_9 = arith.constant 0 : index
    %c0_10 = arith.constant 0 : index
    %22 = vector.load %arg2[%c0_9, %c0_10] : memref<8x128xf32, #tpu.memory_space<vmem>>, vector<8x128xf32>
    %23 = vector.broadcast %21 : f32 to vector<8x128xf32>
    %24 = arith.mulf %22, %23 : vector<8x128xf32>
    %25 = arith.mulf %8, %24 : vector<8x128xf32>
    %c0_11 = arith.constant 0 : index
    %c0_12 = arith.constant 0 : index
    %26 = vector.load %arg3[%c0_11, %c0_12] : memref<8x128xf32, #tpu.memory_space<vmem>>, vector<8x128xf32>
    %27 = arith.addf %25, %26 : vector<8x128xf32>
    %c0_13 = arith.constant 0 : index
    %c0_14 = arith.constant 0 : index
    %c0_15 = arith.constant 0 : index
    %28 = vector.load %arg4[%c0_13, %c0_14, %c0_15] : memref<1x8x128xf32, #tpu.memory_space<vmem>>, vector<1x8x128xf32>
    %29 = vector.shape_cast %28 : vector<1x8x128xf32> to vector<8x128xf32>
    %30 = vector.shape_cast %27 : vector<8x128xf32> to vector<1x8x128xf32>
    tpu.vector_store %arg4[%c0_13, %c0_14, %c0_15], %30 {strides = array<i32>} : memref<1x8x128xf32, #tpu.memory_space<vmem>>, vector<1x8x128xf32>,
    return
  }
  func.func @transform_0(%arg0: i32) -> (i32, i32, i32) {
    %c0_i32 = arith.constant 0 : i32
    %c0_i32_0 = arith.constant 0 : i32
    %c0_i32_1 = arith.constant 0 : i32
    return %arg0, %c0_i32, %c0_i32_0 : i32, i32, i32
  }
  func.func @transform_1(%arg0: i32) -> (i32, i32) {
    %c0_i32 = arith.constant 0 : i32
    %c0_i32_0 = arith.constant 0 : i32
    %c0_i32_1 = arith.constant 0 : i32
    return %c0_i32, %c0_i32_0 : i32, i32
  }
  func.func @transform_2(%arg0: i32) -> (i32, i32) {
    %c0_i32 = arith.constant 0 : i32
    %c0_i32_0 = arith.constant 0 : i32
    %c0_i32_1 = arith.constant 0 : i32
    return %c0_i32, %c0_i32_0 : i32, i32
  }
  func.func @transform_3(%arg0: i32) -> (i32, i32, i32) {
    %c0_i32 = arith.constant 0 : i32
    %c0_i32_0 = arith.constant 0 : i32
    %c0_i32_1 = arith.constant 0 : i32
    return %arg0, %c0_i32, %c0_i32_0 : i32, i32, i32
  }
}

</mosaic_0001>

<bundles_post_ra>
// kernel: tpu_custom_call.1
= control target key start
LH: loop header
LB: loop body
LE: loop exit
PB: predicated region body
PF: predicated region fallthrough
CT: control target
= control target key end

     0   :  { %8 = vsyncpa [#allocation3], 0  ;;  %s870_s0 = inlined_call_operand.hbm [shape: f32[2,8,128], index: 0, kind: input, shape index: {}]   ;;  %s871_s1 = inlined_call_operand.hbm [shape: f32[8,128], index: 1, kind: input, shape index: {}]   ;;  %s872_s2 = inlined_call_operand.hbm [shape: f32[8,128], index: 2, kind: input, shape index: {}]   ;;  %s873_s3 = inlined_call_operand.hbm [shape: f32[2,8,128], index: 3, kind: output, shape index: {}]  }
   0x1   :  { %10 = vsyncpa [#allocation3 + $0x1], 0 }
   0x2   :  { %11 = vsyncpa [#allocation6], 0 }
   0x3   :  { %12 = vsyncpa [#allocation4], 0 }
   0x4   :  { %14 = vsyncpa [#allocation4 + $0x1], 0  ;;  %s641_s12 = smov 0   ;;  %s643_s13 = smov 0  }
   0x5   :  { %s645_s14 = smov 0   ;;  %s647_s15 = smov 0  }
   0x6 LB: > { %s662_s16 = sadd.s32 4294967295, %s614_s15   ;;  %s362_s17 = sadd.s32 4294967294, %s614_s15   ;;  %s614_s15 = sphi %s647_s15, %s893_s15   ;;  %s610_s14 = sphi %s645_s14, %s892_s14   ;;  %s606_s13 = sphi %s643_s13, %s891_s13   ;;  %s602_s12 = sphi %s641_s12, %s890_s12  }
   0x7   : > { %p40_p0 = scmp.ne.s32.totalorder %s606_s13, %s602_s12  ;;  %p874_p1 = scmp.eq.s32.totalorder %s662_s16, 0 }
   0x8   : > { %p112_p3 = scmp.eq.s32.totalorder %s362_s17, 1  ;;  %p363_p5 = scmp.ge.s32.totalorder %s614_s15, 1 }
   0x9   : > { %p671_p4 = por %p874_p1, %p40_p0  ;;  %p119_p7 = scmp.lt.s32.totalorder %s614_s15, 3 }
   0xa   : > { %p676_p6 = por %p112_p3, %p40_p0  ;;  %s616_s21 = smov [#allocation5]  }
   0xb   : > { %s877_s18 = scalar_select %p671_p4, 1, 0 }
   0xc   : > { %s878_s19 = scalar_select %p676_p6, 1, 0 }
   0xd   : > { %p681_p8 = pnand %p363_p5, %p119_p7  ;;  %s132_s22 = sshll.u32 %s616_s21, 4  ;;  %s133_s22 = int_to_ptr.vmem [resolvable:$true] %s132_s22 }
   0xe   : > { %s617_s23 = smov [#allocation7]   ;;  %s697_s26 = sadd.s32 1, %s614_s15  }
   0xf   : > { %s879_s20 = scalar_select %p681_p8, 1, 0 }
  0x10   : > { %p398_p10 = pneg %p681_p8  ;;  %s143_s24 = sshll.u32 %s617_s23, 4  ;;  %s694_s24 = int_to_ptr.vmem [resolvable:$true] %s143_s24 }
  0x11   : > { %s24_s27 = ssub.s32 %s614_s15, %s697_s26  ;;  %s458_s30 = scalar_lea.hbm %s871_s1, 128 }
  0x12   : > { %p690_p11 = pnand %p398_p10, %p874_p1  ;;  %p459_p12 = scmp.ne.s32.totalorder %s871_s1, %s458_s30 }
  0x13   : > { %p465_p5 = scmp.lt.u32.totalorder %s458_s30, %s871_s1 }
  0x14   : > { %p460_p13 = pneg %p690_p11 }
  0x16   : > { %p461_p0 = pnand %p460_p13, %p459_p12 }
  0x18   : > { %p462_p3 = pneg %p461_p0 }
  0x1a   : > { %p467_p7 = pnand %p465_p5, %p462_p3 }
  0x1c   : > { %470 = shalt.err (!%p467_p7)
}
  0x1d   : > { %s471_s8 = scalar_lea.vmem %s133_s22, 128  ;;  %p479_p2 = scmp.lt.s32.totalorder %s133_s22, %s133_s22 }
  0x1e   : > { %p472_p10 = scmp.ne.s32.totalorder %s133_s22, %s471_s8  ;;  %p480_p6 = scmp.lt.s32.totalorder %s471_s8, %s471_s8 }
  0x20   : > { %p474_p9 = pnand %p472_p10, %p460_p13  ;;  %p481_p4 = por %p480_p6, %p479_p2 }
  0x22   : > { %p475_p1 = pneg %p474_p9 }
  0x24   : > { %p482_p8 = pnand %p481_p4, %p475_p1 }
  0x26   : > { %485 = shalt.err (!%p482_p8)
}
  0x27   : > { %401 = dma.hbm_to_vmem [thread:$0]  (!%p690_p11), %s871_s1, 128, %s133_s22, [#allocation6]  }
  0x28   : > { %s486_s21 = scalar_lea.hbm %s872_s2, 128 }
  0x29   : > { %p487_p9 = scmp.ne.s32.totalorder %s872_s2, %s486_s21  ;;  %p493_p4 = scmp.lt.u32.totalorder %s486_s21, %s872_s2 }
  0x2b   : > { %p489_p2 = pnand %p487_p9, %p460_p13 }
  0x2d   : > { %p490_p1 = pneg %p489_p2 }
  0x2f   : > { %p495_p6 = pnand %p493_p4, %p490_p1 }
  0x31   : > { %498 = shalt.err (!%p495_p6)
}
  0x32   : > { %s499_s22 = scalar_lea.vmem %s694_s24, 128  ;;  %p507_p3 = scmp.lt.s32.totalorder %s694_s24, %s694_s24 }
  0x33   : > { %p500_p8 = scmp.ne.s32.totalorder %s694_s24, %s499_s22  ;;  %p508_p5 = scmp.lt.s32.totalorder %s499_s22, %s499_s22 }
  0x35   : > { %p502_p12 = pnand %p500_p8, %p460_p13  ;;  %p509_p7 = por %p508_p5, %p507_p3 }
  0x37   : > { %p503_p0 = pneg %p502_p12 }
  0x39   : > { %p510_p10 = pnand %p509_p7, %p503_p0 }
  0x3b   : > { %513 = shalt.err (!%p510_p10)
}
  0x3c   : > { %404 = dma.hbm_to_vmem [thread:$0]  (!%p690_p11), %s872_s2, 128, %s694_s24, [#allocation6]  }
  0x3d   : > { %p25_p13 = scmp.eq.s32.totalorder %s24_s27, 0  ;;  %s27_s6 = sadd.s32 1, %s610_s14 }
  0x3e   : > { %p34_p9 = scmp.ne.s32.totalorder %s610_s14, %s606_s13  ;;  %p35_p2 = scmp.eq.s32.totalorder %s614_s15, 0 }
  0x3f   : > { %s756_s25 = scalar_select %p25_p13, %s610_s14, %s27_s6  }
  0x40   : > { %p36_p1 = por %p35_p2, %p34_p9  ;;  %p881_p4 = scmp.eq.s32.totalorder %s662_s16, 1 }
  0x41   : > { %p415_p8 = scmp.lt.s32.totalorder %s614_s15, 2  ;;  %s154_s8 = sand.u32 1, %s610_s14  }
  0x42   : > { %p760_p6 = por %p881_p4, %p34_p9  ;;  %s367_s9 = sshll.u32 %s154_s8, 3 }
  0x43   : > { %s368_s10 = sshll.u32 %s614_s15, 7  ;;  %s158_s27 = scalar_lea.vmem [#allocation2], %s367_s9 }
  0x44   : > { %s770_s24 = scalar_lea.hbm %s870_s0, %s368_s10  ;;  %s165_s21 = sshll.u32 %s158_s27, 4  ;;  %s772_s21 = int_to_ptr.vmem [resolvable:$true] %s165_s21 }
  0x45   : > { %p774_p11 = pnand %p415_p8, %p36_p1  ;;  %s155_s28 = scalar_lea.sflag [#allocation3], %s154_s8 }
  0x46   : > { %s514_s29 = scalar_lea.hbm %s770_s24, 128  ;;  %s519_s4 = scalar_lea.hbm %s870_s0, 256 }
  0x47   : > { %p515_p12 = scmp.ne.s32.totalorder %s770_s24, %s514_s29  ;;  %p516_p0 = pneg %p774_p11 }
  0x48   : > { %p520_p7 = scmp.lt.u32.totalorder %s770_s24, %s870_s0  ;;  %p521_p10 = scmp.lt.u32.totalorder %s519_s4, %s514_s29 }
  0x49   : > { %p517_p3 = pnand %p516_p0, %p515_p12  ;;  %p523_p9 = scmp.lt.u32.totalorder %s514_s29, %s770_s24 }
  0x4a   : > { %p522_p13 = por %p521_p10, %p520_p7 }
  0x4b   : > { %p518_p5 = pneg %p517_p3 }
  0x4c   : > { %p524_p2 = por %p523_p9, %p522_p13 }
  0x4e   : > { %p525_p1 = pnand %p524_p2, %p518_p5 }
  0x50   : > { %528 = shalt.err (!%p525_p1)
}
  0x51   : > { %s529_s8 = scalar_lea.vmem %s772_s21, 128  ;;  %s618_s9 = smov [#allocation2]  }
  0x52   : > { %p530_p4 = scmp.ne.s32.totalorder %s772_s21, %s529_s8  ;;  %s534_s10 = sshll.u32 %s618_s9, 4  ;;  %s535_s10 = int_to_ptr.vmem [resolvable:$false] %s534_s10 }
  0x53   : > { %s536_s11 = scalar_lea.vmem %s535_s10, 256  ;;  %p537_p3 = scmp.lt.s32.totalorder %s772_s21, %s535_s10 }
  0x54   : > { %p532_p8 = pnand %p530_p4, %p516_p0  ;;  %p538_p7 = scmp.lt.s32.totalorder %s536_s11, %s529_s8 }
  0x56   : > { %p533_p12 = pneg %p532_p8  ;;  %p539_p10 = por %p538_p7, %p537_p3 }
  0x58   : > { %p540_p13 = pnand %p539_p10, %p533_p12 }
  0x5a   : > { %543 = shalt.err (!%p540_p13)
}
  0x5b   : > { %408 = dma.hbm_to_vmem [thread:$0]  (!%p774_p11), %s770_s24, 128, %s772_s21, %s155_s28  }
  0x5c   : > { %p884_p5 = scmp.ne.s32.totalorder %s879_s20, 0 }
  0x5d   : > { %s806_s17 = sand.u32 (!%p884_p5), 1, %s606_s13   ;;  %p885_p0 = scmp.ne.s32.totalorder (!%p884_p5), %s877_s18, 0 }
  0x5e   : > { %174 = sbr.rel (%p884_p5) target bundleno = 677 (0x2a5), region = 32  ;;  %s370_s27 = sshll.u32 (!%p884_p5), %s806_s17, 3 }
  0x5f   : > { %s177_s29 = scalar_lea.sflag (!%p884_p5), [#allocation3], %s806_s17  ;;  %s180_s30 = scalar_lea.vmem (!%p884_p5), [#allocation2], %s370_s27 }
  0x65   : > { %589 = dma.done.wait (%p885_p0), %s177_s29, 128  }
  0x66   : > { %591 = vsyncadd (%p885_p0), %s177_s29, 4294967168  ;;  %p886_p11 = scmp.eq.s32.totalorder %s662_s16, 0 }
  0x68   : > { %593 = dma.done.wait (%p886_p11), [#allocation6], 256   ;;  %p887_p9 = pmov %p886_p11 }
  0x69   : > { %v211_v0 = vld [vmem:[%s180_s30] sm:$0xff]  ;;  %s619_s4 = smov 0.0   ;;  %v252_v26 = vld [vmem:[#allocation5] sm:$0xff]  ;;  %v256_v29 = vld [vmem:[#allocation7] sm:$0xff]  ;;  %s375_s10 = sshll.u32 %s662_s16, 7 }
  0x6a   : > { %595 = vsyncadd (%p887_p9), [#allocation6], 4294967040  ;;  %212 = vadd.xlane.f32.xlu0 %v211_v0  ;;  %s210_s11 = scalar_lea.vmem [#allocation8], %s370_s27  ;;  %s620_s16 = smov [#allocation8]  }
  0x6b   : > { %s273_s29 = sshll.u32 %s210_s11, 4  ;;  %s548_s27 = sshll.u32 %s620_s16, 4  ;;  %s828_s29 = int_to_ptr.vmem [resolvable:$true] %s273_s29  ;;  %s549_s27 = int_to_ptr.vmem [resolvable:$false] %s548_s27 }
  0x6c   : > { %p551_p8 = scmp.lt.s32.totalorder %s828_s29, %s549_s27 }
  0xf7   : > { %v213_v1 = vpop.xlane.xlu0 %212 }
  0xf8   : > { %v214_v2 = vrot.slane %v213_v1, 4 }
  0xfa   : > { %v215_v3 = vadd.f32 %v214_v2, %v213_v1 }
  0xfc   : > { %v216_v4 = vrot.slane %v215_v3, 2 }
  0xfe   : > { %v217_v5 = vadd.f32 %v216_v4, %v215_v3 }
 0x100   : > { %v218_v6 = vrot.slane %v217_v5, 1 }
 0x102   : > { %v219_v7 = vadd.f32 %v218_v6, %v217_v5 }
 0x104   : > { %378 = vpush %v219_v7 }
 0x135   : > { %s379_s20 = spop %378 }
 0x136   : > { %s221_s24 = smul.f32 0.0009765625, %s379_s20 }
 0x138   : > { %v222_v8 = vstv %s221_s24  ;;  %s234_s18 = smul.f32 0.0, %s221_s24 }
 0x139   : > { %v223_v9 = vsub.f32 %v211_v0, %v222_v8 }
 0x13a   : > { %s235_s21 = smul.f32 %s234_s18, %s221_s24  ;;  %s826_s24 = scalar_lea.hbm %s873_s3, %s375_s10 }
 0x13b   : > { %v224_v10 = vmul.f32 %v223_v9, %v223_v9  ;;  %s260_s18 = scalar_lea.sflag [#allocation4], %s806_s17 }
 0x13d   : > { %225 = vadd.xlane.f32.xlu0 %v224_v10 }
 0x1ca   : > { %v226_v11 = vpop.xlane.xlu0 %225 }
 0x1cb   : > { %v227_v12 = vrot.slane %v226_v11, 4 }
 0x1cd   : > { %v228_v13 = vadd.f32 %v227_v12, %v226_v11 }
 0x1cf   : > { %v229_v14 = vrot.slane %v228_v13, 2 }
 0x1d1   : > { %v230_v15 = vadd.f32 %v229_v14, %v228_v13 }
 0x1d3   : > { %v231_v16 = vrot.slane %v230_v15, 1 }
 0x1d5   : > { %v232_v17 = vadd.f32 %v231_v16, %v230_v15 }
 0x1d7   : > { %380 = vpush %v232_v17 }
 0x208   : > { %s381_s23 = spop %380 }
 0x209   : > { %s236_s28 = ssub.f32 %s381_s23, %s235_s21  ;;  %s544_s21 = scalar_lea.vmem %s828_s29, 128 }
 0x20a   : > { %p545_p2 = scmp.ne.s32.totalorder %s828_s29, %s544_s21  ;;  %s550_s23 = scalar_lea.vmem %s549_s27, 256 }
 0x20b   : > { %s237_s22 = smul.f32 0.0009775171, %s236_s28  ;;  %p552_p12 = scmp.lt.s32.totalorder %s550_s23, %s544_s21 }
 0x20c   : > { %p546_p1 = pnand %p545_p2, %p760_p6 }
 0x20d   : > { %s238_s5 = smax.f32 %s619_s4, %s237_s22  ;;  %p553_p3 = por %p552_p12, %p551_p8 }
 0x20e   : > { %v239_v18 = vstv %s238_s5  ;;  %p547_p4 = pneg %p546_p1 }
 0x20f   : > { %454 = vrsqrt.f32 %v239_v18  ;;  %vm242_vm0 = vcmp.eq.f32.partialorder %v239_v18, inf  ;;  %v245_v21 = vand.u32 2147483648, %v239_v18  ;;  %vm244_vm1 = vcmp.eq.f32.partialorder %v239_v18, 0.0 }
 0x210   : > { %p554_p7 = pnand %p553_p3, %p547_p4 }
 0x219   : > { %v455_v19 = vpop.eup %454 }
 0x21a   : > { %v241_v20 = vmul.f32 %v455_v19, %v239_v18 }
 0x21c   : > { %v243_v22 = vsel %vm242_vm0, %v239_v18, %v241_v20 }
 0x21d   : > { %v246_v23 = vsel %vm244_vm1, %v245_v21, %v243_v22 }
 0x21e   : > { %382 = vpush %v246_v23 }
 0x24f   : > { %s383_s6 = spop %382 }
 0x250   : > { %s248_s8 = sadd.f32 1e-05, %s383_s6 }
 0x252   : > { %v249_v24 = vstv %s248_s8 }
 0x253   : > { %456 = vrcp.f32 %v249_v24 }
 0x25d   : > { %v457_v25 = vpop.eup %456 }
 0x25e   : > { %384 = vpush %v457_v25 }
 0x28f   : > { %s385_s9 = spop %384 }
 0x290   : > { %v253_v27 = vstv %s385_s9 }
 0x291   : > { %v254_v28 = vmul.f32 %v253_v27, %v252_v26 }
 0x293   : > { %v255_v30 = vmul.f32 %v254_v28, %v223_v9 }
 0x295   : > { %v257_v31 = vadd.f32 %v256_v29, %v255_v30 }
 0x297   : > { %258 = vst [vmem:[%s210_s11] sm:$0xff] %v257_v31 }
 0x298   : > { %557 = shalt.err (!%p554_p7)
}
 0x299   : > { %s558_s17 = scalar_lea.hbm %s826_s24, 128  ;;  %s562_s4 = scalar_lea.hbm %s873_s3, 256 }
 0x29a   : > { %p559_p10 = scmp.ne.s32.totalorder %s826_s24, %s558_s17  ;;  %p563_p0 = scmp.lt.u32.totalorder %s826_s24, %s873_s3 }
 0x29b   : > { %p564_p11 = scmp.lt.u32.totalorder %s562_s4, %s558_s17  ;;  %p566_p2 = scmp.lt.u32.totalorder %s558_s17, %s826_s24 }
 0x29c   : > { %p560_p13 = pnand %p559_p10, %p760_p6 }
 0x29d   : > { %p565_p9 = por %p564_p11, %p563_p0 }
 0x29e   : > { %p561_p5 = pneg %p560_p13 }
 0x29f   : > { %p567_p1 = por %p566_p2, %p565_p9 }
 0x2a1   : > { %p568_p4 = pnand %p567_p1, %p561_p5 }
 0x2a3   : > { %571 = shalt.err (!%p568_p4)
}
 0x2a4   : > { %396 = dma.vmem_to_hbm [thread:$0]  (%p760_p6), %s828_s29, 128, %s826_s24, %s260_s18  }
 0x2a5 PF: > { %s285_s8 = sand.u32 1, %s602_s12   ;;  %p888_p8 = scmp.ne.s32.totalorder %s878_s19, 0 }
 0x2a6   : > { %p889_p12 = scmp.ge.s32.totalorder %s614_s15, 2  ;;  %s286_s9 = scalar_lea.sflag [#allocation4], %s285_s8 }
 0x2a8   : > { %p410_p3 = pnand %p889_p12, %p888_p8 }
 0x2aa   : > { %597 = dma.done.wait (!%p410_p3), %s286_s9, 128  }
 0x2ab   : > { %599 = vsyncadd (!%p410_p3), %s286_s9, 4294967168  ;;  %p17_p7 = scmp.ge.s32.totalorder %s697_s26, 4   ;;  %s890_s12 = smov %s606_s13 }
 0x2ac   : > { %s891_s13 = smov %s610_s14  ;;  %s892_s14 = smov %s756_s25 }
 0x2ad   : > { %s893_s15 = smov %s697_s26  ;;  %19 = sbr.rel (!%p17_p7) target bundleno = 6 (0x6), region = 85 }
 0x2b4   :  { %291 = vsyncpa [#allocation3], 1 }
 0x2b5   :  { %293 = vsyncpa [#allocation3 + $0x1], 1 }
 0x2b6   :  { %294 = vsyncpa [#allocation6], 1 }
 0x2b7   :  { %295 = vsyncpa [#allocation4], 1 }
 0x2b8   :  { %297 = vsyncpa [#allocation4 + $0x1], 1 }

</bundles_post_ra>
